<compile_context>
chip_gen: v6e
topology: v6e:2x2x1
jax: 0.10.0
libtpu: 0.0.40
codegen_flags: <defaults>
</compile_context>

<pallas_src>
import functools

import jax
import jax.numpy as jnp
from jax import lax
from jax.experimental import pallas as pl
from jax.experimental.pallas import tpu as pltpu


# Max path / codebook count for which the exact VPU select-gather is unrolled;
# beyond this we fall back to an exact one-hot MXU matmul.
_SELECT_GATHER_MAX = 32


# ------------------------------ kernel helpers --------------------------------


def _dist_no_esq(xb, e, precision):
    """||x||^2 - 2 x.e (squared distance minus ||e||^2), shape (bn, M, CS).

    One flattened (bn*M, C) x (C, CS) MXU matmul per grid step.
    """
    bn, M, C = xb.shape
    CS = e.shape[0]
    xf = xb.reshape(bn * M, C)
    xsq = jnp.sum(xf * xf, axis=1, keepdims=True)                    # (bn*M, 1)
    cross = lax.dot_general(xf, e, (((1,), (1,)), ((), ())),
                            precision=precision,
                            preferred_element_type=jnp.float32)      # (bn*M, CS)
    return (xsq - 2.0 * cross).reshape(bn, M, CS)


def _min_argmin_over_m(dist):
    """Per-code min over paths and its index.  dist (bn, M, CS) -> ((bn,CS),(bn,CS))."""
    bn, M, CS = dist.shape
    dmin = jnp.min(dist, axis=1)                                     # (bn, CS)
    m_ids = lax.broadcasted_iota(jnp.int32, (bn, M, CS), 1)
    # NOTE: fill value M is out of range; safe because dmin is derived from this
    # exact dist tensor, so at least one m matches per (b, k).  _gather_rows
    # additionally degrades an out-of-range index to row 0 instead of garbage.
    amin = jnp.min(jnp.where(dist == dmin[:, None, :], m_ids, M), axis=1)
    return dmin, amin


def _gather_rows(xb, idx):
    """out[b, k, :] = xb[b, idx[b, k], :]  (exact; VPU selects for small M).

    xb: (bn, M, C) f32, idx: (bn, K) int32 in [0, M).
    """
    bn, M, C = xb.shape
    K = idx.shape[1]
    if M <= _SELECT_GATHER_MAX:
        out = jnp.broadcast_to(xb[:, 0:1, :], (bn, K, C))
        sel = idx[:, :, None]                                        # (bn, K, 1)
        for m in range(1, M):                                        # M is static
            out = jnp.where(sel == m, xb[:, m:m + 1, :], out)
        return out
    onehot = (lax.broadcasted_iota(jnp.int32, (bn, M, K), 1)
              == idx[:, None, :]).astype(jnp.float32)
    return jnp.einsum('bmk,bmc->bkc', onehot, xb,
                      precision=lax.Precision.HIGHEST,
                      preferred_element_type=jnp.float32)


def _gather_codes(e, idx, bn):
    """out[b, :] = e[idx[b, 0], :]  (exact; VPU selects for small CS)."""
    CS, C = e.shape
    if CS <= _SELECT_GATHER_MAX:
        out = jnp.broadcast_to(e[0:1, :], (bn, C))
        for k in range(1, CS):                                       # CS is static
            out = jnp.where(idx == k, e[k:k + 1, :], out)
        return out
    onehot = (lax.broadcasted_iota(jnp.int32, (bn, CS), 1)
              == idx).astype(jnp.float32)                            # (bn, CS)
    return lax.dot_general(onehot, e, (((1,), (0,)), ((), ())),
                           precision=lax.Precision.HIGHEST,
                           preferred_element_type=jnp.float32)


# --------------------------------- kernels -------------------------------------


def _layer0_kernel(x_ref, embed_ref, res_ref):
    # residual = x - embed[None].  The torch broadcast needs M in {1, CS};
    # M == CS pairs path m with code k == m elementwise (matches torch).
    res_ref[...] = x_ref[...] - embed_ref[...][None]


def _mid_kernel(x_ref, embed_ref, abuf_in_ref, res_ref, abuf_out_ref, *, precision):
    # layer_idx > 0, last == False
    del abuf_in_ref                          # aliased with abuf_out_ref, unused
    xb = x_ref[...]                          # (bn, M, C)
    e = embed_ref[...]                       # (CS, C)

    # ||e_k||^2 is constant over m -> cannot change the argmin over M; dropped.
    dist = _dist_no_esq(xb, e, precision)    # (bn, M, CS)
    _, amin = _min_argmin_over_m(dist)       # (bn, CS)
    abuf_out_ref[0, :, :] = amin

    gathered = _gather_rows(xb, amin)        # (bn, CS, C), exact
    res_ref[...] = gathered - e[None]


def _last_kernel(x_ref, embed_ref, esq_ref, abuf_in_ref,
                 res_ref, abuf_out_ref, amin_curr_ref, *, precision):
    # layer_idx > 0, last == True
    del abuf_in_ref
    xb = x_ref[...]                          # (bn, M, C)
    e = embed_ref[...]                       # (CS, C)
    esq = esq_ref[...]                       # (1, CS)
    bn, M, _ = xb.shape
    CS = e.shape[0]

    dist = _dist_no_esq(xb, e, precision)    # (bn, M, CS), no +esq
    dmin, amin = _min_argmin_over_m(dist)    # (bn, CS) each
    abuf_out_ref[0, :, :] = amin

    # esq only matters for the argmin over CS; add it to the (bn, CS) minima
    # instead of the full (bn, M, CS) tile.
    dmin_full = dmin + esq                                            # (bn, CS)
    k_ids = lax.broadcasted_iota(jnp.int32, (bn, CS), 1)
    gmin = jnp.min(dmin_full, axis=1, keepdims=True)                  # (bn, 1)
    kstar = jnp.min(jnp.where(dmin_full == gmin, k_ids, CS),
                    axis=1, keepdims=True)                            # (bn, 1)
    mstar = jnp.min(jnp.where(k_ids == kstar, amin, M),
                    axis=1, keepdims=True)                            # (bn, 1)
    amin_curr_ref[...] = kstar

    residual_prev = _gather_rows(xb, mstar)                           # (bn, 1, C)
    quantize = _gather_codes(e, kstar, bn)                            # (bn, C)
    res_ref[:, 0, :] = residual_prev[:, 0, :] - quantize


# ------------------------------ block-size picking ------------------------------


def _vmem_capacity_bytes():
    """Per-core VMEM capacity; conservative (v7x per-TC) fallback on failure."""
    try:
        return int(pltpu.get_tpu_info().vmem_capacity_bytes)
    except Exception:
        return 64 * 1024 * 1024


def _per_row_vmem_bytes(M, C, CS):
    """Rough per-batch-row VMEM footprint of the mid/last kernels (f32)."""
    io = 2 * (M * C + CS * C + 4 * CS) * 4            # double-buffered I/O blocks
    interm = (2 * M * CS + 3 * CS * C + M * C) * 4    # dist/cross/gather temps
    return io + interm


def _pick_block_n(n, per_row_bytes, vmem_budget_bytes):
    """Largest batch tile that divides N, fits the VMEM budget, and keeps the
    aliased argmin out-block legal (bn == N or bn % 8 == 0).  Prefers >= 2 grid
    steps (v7x megacore / DMA-compute overlap) when it costs <= 2x in tile size."""
    if n <= 1:
        return max(n, 1)
    cap = min(n, 1024, max(1, vmem_budget_bytes // max(per_row_bytes, 1)))
    cands = [d for d in range(1, cap + 1)
             if n % d == 0 and (d == n or d % 8 == 0)]
    if not cands:
        return n
    best = max(cands)
    multi = [d for d in cands if n // d >= 2]
    if multi and 2 * max(multi) >= best:
        best = max(multi)
    return best


# ---------------------------------- wrapper -------------------------------------


def euclidean_codebook_forward(x, embed, argmin_buf, layer_idx, last,
                               block_n=None, esq=None,
                               cross_precision=lax.Precision.HIGHEST):
    """Pallas EuclideanCodebook.forward.

    x: (N, M, C) f32, embed: (CS, C) f32, argmin_buf: (L, N, CS) int32.
    Returns (residual, argmin_curr_or_None, updated_argmin_buf).
    """
    N, M, C = x.shape
    CS, Ce = embed.shape
    assert Ce == C

    vmem_cap = _vmem_capacity_bytes()
    # Explicit scoped-VMEM limit with headroom (v5e default is only 16 MiB).
    vmem_limit = int(vmem_cap * 3 // 4)
    if block_n is None:
        block_n = _pick_block_n(N, _per_row_vmem_bytes(M, C, CS),
                                int(vmem_cap * 2 // 5))
    bn = block_n
    assert N % bn == 0, "block_n must divide the batch size"
    grid = (N // bn,)
    params = pltpu.CompilerParams(dimension_semantics=("parallel",),
                                  vmem_limit_bytes=vmem_limit)

    x_spec = pl.BlockSpec((bn, M, C), lambda b: (b, 0, 0))
    embed_spec = pl.BlockSpec((CS, C), lambda b: (0, 0))   # VMEM-resident, const map

    if layer_idx == 0:
        # torch broadcast (N, M, C) - (1, CS, C) requires M in {1, CS}.
        assert M in (1, CS), "layer 0 broadcast requires M == 1 or M == CS"
        residual = pl.pallas_call(
            _layer0_kernel,
            out_shape=jax.ShapeDtypeStruct((N, CS, C), jnp.float32),
            grid=grid,
            in_specs=[x_spec, embed_spec],
            out_specs=pl.BlockSpec((bn, CS, C), lambda b: (b, 0, 0)),
            compiler_params=params,
        )(x, embed)
        return residual, None, argmin_buf

    L = argmin_buf.shape[0]
    assert 1 <= layer_idx <= L
    assert bn == N or bn % 8 == 0, (
        "block_n must equal N or be a multiple of 8 (argmin output tiling)")
    li = layer_idx - 1
    # argmin_buf[layer_idx-1] is written in place via input/output aliasing.
    abuf_spec = pl.BlockSpec((1, bn, CS), lambda b: (li, b, 0))
    abuf_shape = jax.ShapeDtypeStruct(argmin_buf.shape, argmin_buf.dtype)

    if not last:
        residual, argmin_buf = pl.pallas_call(
            functools.partial(_mid_kernel, precision=cross_precision),
            out_shape=(jax.ShapeDtypeStruct((N, CS, C), jnp.float32),
                       abuf_shape),
            grid=grid,
            in_specs=[x_spec, embed_spec, abuf_spec],
            out_specs=(pl.BlockSpec((bn, CS, C), lambda b: (b, 0, 0)),
                       abuf_spec),
            input_output_aliases={2: 1},
            compiler_params=params,
        )(x, embed, argmin_buf)
        return residual, None, argmin_buf

    # ||e_k||^2 hoisted out of the kernel; only the last layer needs it.
    if esq is None:
        esq = jnp.sum(embed.astype(jnp.float32) ** 2, axis=1).reshape(1, CS)
    residual, argmin_buf, argmin_curr = pl.pallas_call(
        functools.partial(_last_kernel, precision=cross_precision),
        out_shape=(jax.ShapeDtypeStruct((N, 1, C), jnp.float32),
                   abuf_shape,
                   jax.ShapeDtypeStruct((N, 1), jnp.int32)),
        grid=grid,
        in_specs=[x_spec, embed_spec,
                  pl.BlockSpec((1, CS), lambda b: (0, 0)),
                  abuf_spec],
        out_specs=(pl.BlockSpec((bn, 1, C), lambda b: (b, 0, 0)),
                   abuf_spec,
                   pl.BlockSpec((bn, 1), lambda b: (b, 0))),
        input_output_aliases={3: 1},
        compiler_params=params,
    )(x, embed, esq, argmin_buf)
    return residual, argmin_curr, argmin_buf


# ------------------------------ reference helpers -------------------------------


def _exact_dist(x, embed):
    """Exact (no-cancellation) squared Euclidean distances, shape (N, M, CS)."""
    return jnp.sum((x[:, :, None, :] - embed[None, None, :, :]) ** 2, axis=-1)


# ----------------------------------- main ---------------------------------------


if __name__ == "__main__":
    key = jax.random.PRNGKey(0)
    N, C, CS = 16, 32, 16            # batch, dim, codebook_size
    num_layers = 3

    k_e, k_x = jax.random.split(key)
    embed = jax.random.normal(k_e, (CS, C), dtype=jnp.float32)   # torch.randn(CS, dim)
    x0 = jax.random.normal(k_x, (N, 1, C), dtype=jnp.float32)
    argmin_buf = jnp.zeros((num_layers - 1, N, CS), dtype=jnp.int32)

    # layer 0 / layer 1 (middle) / layer 2 (last)
    r0, a0, argmin_buf = euclidean_codebook_forward(x0, embed, argmin_buf, 0, False)
    r1, a1, argmin_buf = euclidean_codebook_forward(r0, embed, argmin_buf, 1, False)
    r2, a2, argmin_buf = euclidean_codebook_forward(r1, embed, argmin_buf, 2, True)
    jax.block_until_ready((r0, r1, r2, a2, argmin_buf))

    # NOTE: exact (path, code) ties exist by construction in this VQ structure, so
    # argmin indices are validated by distance-optimality (not index equality) and
    # residuals are validated for consistency with the kernel's own chosen indices.
    TOL_D = 5e-2        # distance-optimality slack (distances are O(100))
    TOL_R = 1e-4        # residual reconstruction tolerance

    # ---- layer 0 ----
    assert r0.shape == (N, CS, C)
    assert a0 is None and a1 is None
    assert jnp.allclose(r0, x0 - embed[None], atol=1e-5, rtol=1e-5), "layer0 residual"

    # ---- layer 1 (middle) ----
    aprev1 = argmin_buf[0]                                   # (N, CS) from the kernel
    d1 = _exact_dist(r0, embed)                              # (N, M, CS)
    assert bool(jnp.all((aprev1 >= 0) & (aprev1 < r0.shape[1]))), "mid argmin out of range"
    got1 = jnp.take_along_axis(d1, aprev1[:, None, :], axis=1)[:, 0, :]
    assert bool(jnp.all(got1 <= d1.min(axis=1) + TOL_D)), "mid argmin not optimal"
    exp_r1 = r0[jnp.arange(N)[:, None], aprev1, :] - embed[None, :, :]
    assert jnp.allclose(r1, exp_r1, atol=TOL_R, rtol=TOL_R), "mid residual inconsistent"

    # ---- layer 2 (last) ----
    aprev2 = argmin_buf[1]                                   # (N, CS)
    d2 = _exact_dist(r1, embed)                              # (N, M, CS)
    dmin2 = d2.min(axis=1)                                   # (N, CS)
    assert bool(jnp.all((aprev2 >= 0) & (aprev2 < r1.shape[1]))), "last aprev out of range"
    got2 = jnp.take_along_axis(d2, aprev2[:, None, :], axis=1)[:, 0, :]
    assert bool(jnp.all(got2 <= dmin2 + TOL_D)), "last aprev not optimal"
    assert a2.shape == (N, 1) and a2.dtype == jnp.int32
    assert bool(jnp.all((a2 >= 0) & (a2 < CS))), "argmin_curr out of range"
    got_k = jnp.take_along_axis(dmin2, a2, axis=1)[:, 0]
    assert bool(jnp.all(got_k <= dmin2.min(axis=1) + TOL_D)), "argmin_curr not optimal"
    mstar = jnp.take_along_axis(aprev2, a2, axis=1)[:, 0]    # (N,)
    exp_r2 = r1[jnp.arange(N), mstar, :] - embed[a2[:, 0], :]
    assert r2.shape == (N, 1, C)
    assert jnp.allclose(r2[:, 0, :], exp_r2, atol=TOL_R, rtol=TOL_R), "last residual inconsistent"

    print("KERNEL_OK")
</pallas_src>

<mosaic_0001>
module attributes {stable_mosaic.version = 11 : i64} {
  func.func @_layer0_kernel(%arg0: i32, %arg1: memref<8x1x32xf32, #tpu.memory_space<vmem>>, %arg2: memref<16x32xf32, #tpu.memory_space<vmem>>, %arg3: memref<8x16x32xf32, #tpu.memory_space<vmem>>) attributes {dimension_semantics = [#tpu.dimension_semantics<parallel>], iteration_bounds = array<i64: 2>, scalar_prefetch = 0 : i64, scratch_operands = 0 : i64, tpu.core_type = #tpu.core_type<tc>, window_params = [{transform_indices = @transform_0, window_bounds = array<i64: 8, 1, 32>}, {pipeline_mode = #tpu.pipeline_mode<synchronous>, transform_indices = @transform_1, window_bounds = array<i64: 16, 32>}, {transform_indices = @transform_2, window_bounds = array<i64: 8, 16, 32>}]} {
    %c0 = arith.constant 0 : index
    %c0_0 = arith.constant 0 : index
    %c0_1 = arith.constant 0 : index
    %0 = vector.load %arg1[%c0, %c0_0, %c0_1] : memref<8x1x32xf32, #tpu.memory_space<vmem>>, vector<8x1x32xf32>
    %c0_2 = arith.constant 0 : index
    %c0_3 = arith.constant 0 : index
    %1 = vector.load %arg2[%c0_2, %c0_3] : memref<16x32xf32, #tpu.memory_space<vmem>>, vector<16x32xf32>
    %2 = vector.shape_cast %1 : vector<16x32xf32> to vector<1x16x32xf32>
    %3 = vector.broadcast %0 : vector<8x1x32xf32> to vector<8x16x32xf32>
    %4 = vector.broadcast %2 : vector<1x16x32xf32> to vector<8x16x32xf32>
    %5 = arith.subf %3, %4 : vector<8x16x32xf32>
    %c0_4 = arith.constant 0 : index
    %c0_5 = arith.constant 0 : index
    %c0_6 = arith.constant 0 : index
    %6 = vector.load %arg3[%c0_4, %c0_5, %c0_6] : memref<8x16x32xf32, #tpu.memory_space<vmem>>, vector<8x16x32xf32>
    tpu.vector_store %arg3[%c0_4, %c0_5, %c0_6], %5 {strides = array<i32>} : memref<8x16x32xf32, #tpu.memory_space<vmem>>, vector<8x16x32xf32>,
    return
  }
  func.func @transform_0(%arg0: i32) -> (i32, i32, i32) {
    %c0_i32 = arith.constant 0 : i32
    %c0_i32_0 = arith.constant 0 : i32
    %c0_i32_1 = arith.constant 0 : i32
    return %arg0, %c0_i32, %c0_i32_0 : i32, i32, i32
  }
  func.func @transform_1(%arg0: i32) -> (i32, i32) {
    %c0_i32 = arith.constant 0 : i32
    %c0_i32_0 = arith.constant 0 : i32
    %c0_i32_1 = arith.constant 0 : i32
    return %c0_i32, %c0_i32_0 : i32, i32
  }
  func.func @transform_2(%arg0: i32) -> (i32, i32, i32) {
    %c0_i32 = arith.constant 0 : i32
    %c0_i32_0 = arith.constant 0 : i32
    %c0_i32_1 = arith.constant 0 : i32
    return %arg0, %c0_i32, %c0_i32_0 : i32, i32, i32
  }
}

</mosaic_0001>

<bundles_post_ra>
// kernel: tpu_custom_call.1
= control target key start
LH: loop header
LB: loop body
LE: loop exit
PB: predicated region body
PF: predicated region fallthrough
CT: control target
= control target key end

     0   :  { %7 = vsyncpa [#allocation3], 0  ;;  %s834_s0 = inlined_call_operand.hbm [shape: f32[16,1,32], index: 0, kind: input, shape index: {}]   ;;  %s835_s1 = inlined_call_operand.hbm [shape: f32[16,32], index: 1, kind: input, shape index: {}]   ;;  %s836_s2 = inlined_call_operand.hbm [shape: f32[16,16,32], index: 2, kind: output, shape index: {}]  }
   0x1   :  { %9 = vsyncpa [#allocation3 + $0x1], 0 }
   0x2   :  { %10 = vsyncpa [#allocation6], 0 }
   0x3   :  { %11 = vsyncpa [#allocation4], 0 }
   0x4   :  { %13 = vsyncpa [#allocation4 + $0x1], 0  ;;  %s607_s9 = smov 0   ;;  %s609_s10 = smov 0  }
   0x5   :  { %s611_s11 = smov 0   ;;  %s613_s12 = smov 0  }
   0x6 LB: > { %s628_s13 = sadd.s32 4294967295, %s581_s12   ;;  %s368_s14 = sadd.s32 4294967294, %s581_s12   ;;  %s581_s12 = sphi %s613_s12, %s858_s12   ;;  %s577_s11 = sphi %s611_s11, %s857_s11   ;;  %s573_s10 = sphi %s609_s10, %s856_s10   ;;  %s569_s9 = sphi %s607_s9, %s855_s9  }
   0x7   : > { %p39_p0 = scmp.ne.s32.totalorder %s573_s10, %s569_s9  ;;  %p837_p1 = scmp.eq.s32.totalorder %s628_s13, 0 }
   0x8   : > { %p90_p3 = scmp.eq.s32.totalorder %s368_s14, 1  ;;  %p369_p5 = scmp.ge.s32.totalorder %s581_s12, 1 }
   0x9   : > { %p637_p4 = por %p837_p1, %p39_p0  ;;  %p97_p7 = scmp.lt.s32.totalorder %s581_s12, 3 }
   0xa   : > { %p642_p6 = por %p90_p3, %p39_p0  ;;  %s583_s18 = smov [#allocation5]  }
   0xb   : > { %s841_s15 = scalar_select %p637_p4, 1, 0 }
   0xc   : > { %s842_s16 = scalar_select %p642_p6, 1, 0 }
   0xd   : > { %p647_p8 = pnand %p369_p5, %p97_p7  ;;  %s109_s19 = sshll.u32 %s583_s18, 4  ;;  %s110_s19 = int_to_ptr.vmem [resolvable:$true] %s109_s19 }
   0xe   : > { %s661_s21 = sadd.s32 1, %s581_s12   ;;  %s26_s22 = sadd.s32 1, %s577_s11 }
   0xf   : > { %s843_s17 = scalar_select %p647_p8, 1, 0 }
  0x10   : > { %p404_p9 = pneg %p647_p8  ;;  %s23_s23 = ssub.s32 %s581_s12, %s661_s21 }
  0x11   : > { %s470_s24 = scalar_lea.vmem %s110_s19, 256  ;;  %p478_p5 = scmp.lt.s32.totalorder %s110_s19, %s110_s19 }
  0x12   : > { %p656_p11 = pnand %p404_p9, %p837_p1  ;;  %p471_p13 = scmp.ne.s32.totalorder %s110_s19, %s470_s24 }
  0x13   : > { %p479_p7 = scmp.lt.s32.totalorder %s470_s24, %s470_s24 }
  0x14   : > { %p461_p12 = pneg %p656_p11 }
  0x15   : > { %p480_p10 = por %p479_p7, %p478_p5 }
  0x16   : > { %p473_p0 = pnand %p471_p13, %p461_p12 }
  0x18   : > { %p474_p3 = pneg %p473_p0 }
  0x1a   : > { %p481_p2 = pnand %p480_p10, %p474_p3 }
  0x1c   : > { %484 = shalt.err (!%p481_p2)
}
  0x1d   : > { %s584_s25 = smov 128   ;;  %s585_s26 = smov 8  }
  0x1e   : > { %407 = dma.hbm_to_vmem [thread:$0]  (!%p656_p11), %s835_s1, 256, %s110_s19, [#allocation6], %s584_s25, %s584_s25, %s585_s26  }
  0x1f   : > { %p24_p9 = scmp.eq.s32.totalorder %s23_s23, 0  ;;  %p33_p12 = scmp.ne.s32.totalorder %s577_s11, %s573_s10 }
  0x20   : > { %p34_p10 = scmp.eq.s32.totalorder %s581_s12, 0  ;;  %p417_p2 = scmp.lt.s32.totalorder %s581_s12, 2 }
  0x21   : > { %s678_s29 = scalar_select %p24_p9, %s577_s11, %s26_s22  }
  0x22   : > { %p35_p13 = por %p34_p10, %p33_p12  ;;  %p845_p0 = scmp.eq.s32.totalorder %s628_s13, 1 }
  0x23   : > { %s123_s3 = sand.u32 1, %s577_s11   ;;  %s393_s4 = sshll.u32 %s581_s12, 7 }
  0x24   : > { %p682_p3 = por %p845_p0, %p33_p12  ;;  %s372_s5 = sshll.u32 %s123_s3, 3 }
  0x25   : > { %s691_s8 = scalar_lea.hbm %s834_s0, %s393_s4  ;;  %s127_s14 = scalar_lea.vmem [#allocation2], %s372_s5 }
  0x26   : > { %s846_s30 = scalar_select %p682_p3, 1, 0 }
  0x27   : > { %s134_s18 = sshll.u32 %s127_s14, 4  ;;  %p693_p11 = pnand %p417_p2, %p35_p13  ;;  %s697_s18 = int_to_ptr.vmem [resolvable:$true] %s134_s18 }
  0x28   : > { %s699_s20 = scalar_lea.sflag [#allocation3], %s123_s3  ;;  %s485_s22 = scalar_lea.hbm %s691_s8, 128 }
  0x29   : > { %p486_p5 = scmp.ne.s32.totalorder %s691_s8, %s485_s22  ;;  %p487_p7 = pneg %p693_p11 }
  0x2a   : > { %s490_s25 = scalar_lea.hbm %s834_s0, 256  ;;  %p491_p10 = scmp.lt.s32.totalorder %s691_s8, %s834_s0 }
  0x2b   : > { %p488_p9 = pnand %p487_p7, %p486_p5  ;;  %p492_p2 = scmp.lt.s32.totalorder %s490_s25, %s485_s22 }
  0x2d   : > { %p489_p12 = pneg %p488_p9  ;;  %p493_p13 = por %p492_p2, %p491_p10 }
  0x2f   : > { %p494_p0 = pnand %p493_p13, %p489_p12 }
  0x31   : > { %497 = shalt.err (!%p494_p0)
}
  0x32   : > { %s498_s28 = scalar_lea.vmem %s697_s18, 128  ;;  %s586_s3 = smov [#allocation2]  }
  0x33   : > { %p499_p1 = scmp.ne.s32.totalorder %s697_s18, %s498_s28  ;;  %s503_s4 = sshll.u32 %s586_s3, 4  ;;  %s504_s4 = int_to_ptr.vmem [resolvable:$false] %s503_s4 }
  0x34   : > { %s505_s5 = scalar_lea.vmem %s504_s4, 256  ;;  %p506_p9 = scmp.lt.s32.totalorder %s697_s18, %s504_s4 }
  0x35   : > { %p501_p6 = pnand %p499_p1, %p487_p7  ;;  %p507_p3 = scmp.lt.s32.totalorder %s505_s5, %s498_s28 }
  0x37   : > { %p502_p5 = pneg %p501_p6  ;;  %p508_p4 = por %p507_p3, %p506_p9 }
  0x39   : > { %p509_p8 = pnand %p508_p4, %p502_p5 }
  0x3b   : > { %512 = shalt.err (!%p509_p8)
}
  0x3c   : > { %s587_s6 = smov 16   ;;  %s588_s7 = smov 1  }
  0x3d   : > { %411 = dma.hbm_to_vmem [thread:$0]  (!%p693_p11), %s691_s8, 128, %s697_s18, %s699_s20, %s587_s6, %s587_s6, %s588_s7  }
  0x3e   : > { %p848_p1 = scmp.ne.s32.totalorder %s843_s17, 0 }
  0x3f   : > { %s723_s14 = sand.u32 (!%p848_p1), 1, %s573_s10   ;;  %p849_p4 = scmp.ne.s32.totalorder (!%p848_p1), %s841_s15, 0 }
  0x40   : > { %146 = sbr.rel (%p848_p1) target bundleno = 101 (0x65), region = 28  ;;  %s376_s22 = sshll.u32 (!%p848_p1), %s723_s14, 3 }
  0x41   : > { %s149_s23 = scalar_lea.sflag (!%p848_p1), [#allocation3], %s723_s14  ;;  %s727_s24 = scalar_lea.vmem (!%p848_p1), [#allocation2], %s376_s22 }
  0x45   : > { %556 = dma.done.wait (%p849_p4), %s149_s23, 128  }
  0x46   : > { %558 = vsyncadd (%p849_p4), %s149_s23, 4294967168  ;;  %p850_p6 = scmp.eq.s32.totalorder %s628_s13, 0 }
  0x48   : > { %560 = dma.done.wait (%p850_p6), [#allocation6], 256   ;;  %p851_p8 = pmov %p850_p6 }
  0x49   : > { %s378_s17 = sshll.u32 %s723_s14, 7  ;;  %vm253_vm0 = vcmask 261120   ;;  %v379_v0 = vld [vmem:[%s727_s24] ss:$0 sm:$0xff]  ;;  %v187_v1 = vld [vmem:[#allocation5] sm:$0xff]  ;;  %v188_v2 = vld [vmem:[#allocation5 + $0x8] sm:$0xff] }
  0x4a   : > { %562 = vsyncadd (%p851_p8), [#allocation6], 4294967040  ;;  %s395_s15 = sshll.u32 %s628_s13, 11  ;;  %s740_s8 = scalar_lea.vmem [#allocation7], %s378_s17  ;;  %v237_v3 = vsub.f32 %v379_v0, %v187_v1  ;;  %v238_v4 = vsub.f32 %v379_v0, %v188_v2  ;;  %v380_v5 = vld [vmem:[%s727_s24 + $0x1] ss:$0 sm:$0xff] }
  0x4b   : > { %s285_s18 = sshll.u32 %s740_s8, 4  ;;  %v381_v6 = vld [vmem:[%s727_s24 + $0x2] ss:$0 sm:$0xff]  ;;  %v382_v7 = vld [vmem:[%s727_s24 + $0x3] ss:$0 sm:$0xff]  ;;  %v239_v8 = vsub.f32 %v380_v5, %v187_v1  ;;  %v240_v9 = vsub.f32 %v380_v5, %v188_v2  ;;  %s767_s25 = scalar_lea.hbm %s836_s2, %s395_s15  ;;  %s771_s18 = int_to_ptr.vmem [resolvable:$true] %s285_s18 }
  0x4c   : > { %v241_v10 = vsub.f32 %v381_v6, %v187_v1  ;;  %v242_v11 = vsub.f32 %v381_v6, %v188_v2  ;;  %v383_v12 = vld [vmem:[%s727_s24 + $0x4] ss:$0 sm:$0xff]  ;;  %v384_v13 = vld [vmem:[%s727_s24 + $0x5] ss:$0 sm:$0xff]  ;;  %v385_v14 = vld [vmem:[%s727_s24 + $0x6] ss:$0 sm:$0xff]  ;;  %v243_v15 = vsub.f32 %v382_v7, %v187_v1  ;;  %v244_v16 = vsub.f32 %v382_v7, %v188_v2 }
  0x4d   : > { %254 = vst.msk [vmem:[%s740_s8] sm:$0xff] %vm253_vm0, %v237_v3  ;;  %255 = vst.msk [vmem:[%s740_s8 + $0x8] sm:$0xff] %vm253_vm0, %v238_v4  ;;  %v245_v17 = vsub.f32 %v383_v12, %v187_v1  ;;  %v246_v18 = vsub.f32 %v383_v12, %v188_v2  ;;  %v386_v19 = vld [vmem:[%s727_s24 + $0x7] ss:$0 sm:$0xff]  ;;  %v247_v20 = vsub.f32 %v384_v13, %v187_v1  ;;  %s271_s13 = scalar_lea.sflag [#allocation4], %s723_s14  ;;  %s513_s26 = scalar_lea.vmem %s771_s18, 2048 }
  0x4e   : > { %256 = vst.msk [vmem:[%s740_s8 + $0x10] sm:$0xff] %vm253_vm0, %v239_v8  ;;  %257 = vst.msk [vmem:[%s740_s8 + $0x18] sm:$0xff] %vm253_vm0, %v240_v9  ;;  %v248_v21 = vsub.f32 %v384_v13, %v188_v2  ;;  %v249_v22 = vsub.f32 %v385_v14, %v187_v1  ;;  %v250_v23 = vsub.f32 %v385_v14, %v188_v2  ;;  %p514_p3 = scmp.ne.s32.totalorder %s771_s18, %s513_s26  ;;  %p852_p11 = scmp.ne.s32.totalorder %s846_s30, 0 }
  0x4f   : > { %258 = vst.msk [vmem:[%s740_s8 + $0x20] sm:$0xff] %vm253_vm0, %v241_v10  ;;  %259 = vst.msk [vmem:[%s740_s8 + $0x28] sm:$0xff] %vm253_vm0, %v242_v11  ;;  %v251_v24 = vsub.f32 %v386_v19, %v187_v1  ;;  %v252_v25 = vsub.f32 %v386_v19, %v188_v2  ;;  %s589_s27 = smov [#allocation7]  }
  0x50   : > { %260 = vst.msk [vmem:[%s740_s8 + $0x30] sm:$0xff] %vm253_vm0, %v243_v15  ;;  %261 = vst.msk [vmem:[%s740_s8 + $0x38] sm:$0xff] %vm253_vm0, %v244_v16  ;;  %p515_p7 = pnand %p514_p3, %p852_p11  ;;  %s517_s28 = sshll.u32 %s589_s27, 4  ;;  %s518_s28 = int_to_ptr.vmem [resolvable:$false] %s517_s28 }
  0x51   : > { %262 = vst.msk [vmem:[%s740_s8 + $0x40] sm:$0xff] %vm253_vm0, %v245_v17  ;;  %263 = vst.msk [vmem:[%s740_s8 + $0x48] sm:$0xff] %vm253_vm0, %v246_v18  ;;  %s519_s3 = scalar_lea.vmem %s518_s28, 4096  ;;  %p520_p10 = scmp.lt.s32.totalorder %s771_s18, %s518_s28 }
  0x52   : > { %264 = vst.msk [vmem:[%s740_s8 + $0x50] sm:$0xff] %vm253_vm0, %v247_v20  ;;  %265 = vst.msk [vmem:[%s740_s8 + $0x58] sm:$0xff] %vm253_vm0, %v248_v21  ;;  %p516_p12 = pneg %p515_p7  ;;  %p521_p2 = scmp.lt.s32.totalorder %s519_s3, %s513_s26 }
  0x53   : > { %266 = vst.msk [vmem:[%s740_s8 + $0x60] sm:$0xff] %vm253_vm0, %v249_v22  ;;  %267 = vst.msk [vmem:[%s740_s8 + $0x68] sm:$0xff] %vm253_vm0, %v250_v23 }
  0x54   : > { %268 = vst.msk [vmem:[%s740_s8 + $0x70] sm:$0xff] %vm253_vm0, %v251_v24  ;;  %269 = vst.msk [vmem:[%s740_s8 + $0x78] sm:$0xff] %vm253_vm0, %v252_v25  ;;  %p522_p13 = por %p521_p2, %p520_p10 }
  0x56   : > { %p523_p0 = pnand %p522_p13, %p516_p12 }
  0x58   : > { %526 = shalt.err (!%p523_p0)
}
  0x59   : > { %s527_s4 = scalar_lea.hbm %s767_s25, 2048  ;;  %s531_s7 = scalar_lea.hbm %s836_s2, 4096 }
  0x5a   : > { %p528_p5 = scmp.ne.s32.totalorder %s767_s25, %s527_s4  ;;  %p532_p4 = scmp.lt.s32.totalorder %s767_s25, %s836_s2 }
  0x5b   : > { %p533_p6 = scmp.lt.s32.totalorder %s531_s7, %s527_s4 }
  0x5c   : > { %p529_p9 = pnand %p528_p5, %p852_p11 }
  0x5d   : > { %p534_p8 = por %p533_p6, %p532_p4 }
  0x5e   : > { %p530_p1 = pneg %p529_p9 }
  0x60   : > { %p535_p3 = pnand %p534_p8, %p530_p1 }
  0x62   : > { %538 = shalt.err (!%p535_p3)
}
  0x63   : > { %s590_s24 = smov 128   ;;  %s591_s17 = smov 8  }
  0x64   : > { %402 = dma.vmem_to_hbm [thread:$0]  (%p852_p11), %s771_s18, 2048, %s767_s25, %s271_s13, %s590_s24, %s590_s24, %s591_s17  }
  0x65 PF: > { %s300_s15 = sand.u32 1, %s569_s9   ;;  %p853_p7 = scmp.ne.s32.totalorder %s842_s16, 0 }
  0x66   : > { %p854_p12 = scmp.ge.s32.totalorder %s581_s12, 2  ;;  %s301_s8 = scalar_lea.sflag [#allocation4], %s300_s15 }
  0x68   : > { %p413_p10 = pnand %p854_p12, %p853_p7 }
  0x6a   : > { %p414_p2 = pneg %p413_p10 }
  0x6c   : > { %564 = dma.done.wait (%p414_p2), %s301_s8, 2048  }
  0x6d   : > { %566 = vsyncadd (%p414_p2), %s301_s8, 4294965248  ;;  %p16_p13 = scmp.ge.s32.totalorder %s661_s21, 4   ;;  %s855_s9 = smov %s573_s10 }
  0x6e   : > { %s856_s10 = smov %s577_s11  ;;  %s857_s11 = smov %s678_s29 }
  0x6f   : > { %s858_s12 = smov %s661_s21  ;;  %18 = sbr.rel (!%p16_p13) target bundleno = 6 (0x6), region = 77 }
  0x74   :  { %306 = vsyncpa [#allocation3], 1 }
  0x75   :  { %308 = vsyncpa [#allocation3 + $0x1], 1 }
  0x76   :  { %309 = vsyncpa [#allocation6], 1 }
  0x77   :  { %310 = vsyncpa [#allocation4], 1 }
  0x78   :  { %312 = vsyncpa [#allocation4 + $0x1], 1 }

</bundles_post_ra>
